<compile_context>
chip_gen: v7x
topology: tpu7x:2x2x1
jax: 0.10.0
libtpu: 0.0.40
codegen_flags: <defaults>
</compile_context>

<pallas_src>
import jax
import jax.numpy as jnp
from jax.experimental import pallas as pl
from jax.experimental.pallas import tpu as pltpu

_LANE = 128
_SUBLANE = 8
_NUM_WEIGHT_ARGS = 12  # 6 linear layers x (W, b)
_WEIGHT_KEYS = ("we0", "be0", "we1", "be1", "we2", "be2",
                "wd0", "bd0", "wd1", "bd1", "wd2", "bd2")


def _round_up(n, m):
    return ((n + m - 1) // m) * m


def _lane_pad(n):
    return _round_up(n, _LANE)


def prepare_params(params, compute_dtype=jnp.bfloat16):
    """Cast weights to the MXU compute dtype once; biases stay f32 (1, out).

    Call this once at init and reuse the result across forward calls — it removes
    the per-call weight cast/copy traffic entirely.
    """
    if params.get("_prepared", False):
        return params
    out = {"_prepared": True}
    for k in _WEIGHT_KEYS:
        a = jnp.asarray(params[k])
        if k[0] == "w":                       # weight stored (in, out): y = x @ W + b
            out[k] = a.astype(compute_dtype)
        else:                                 # bias (1, out): f32, added to f32 acc
            out[k] = a.reshape(1, -1).astype(jnp.float32)
    return out


def _pick_batch_tile(B, batch_tile=None, target=512):
    """Choose (rows_per_step, num_steps) for the batch grid axis.

    Targets ~512-row tiles (mem-bound sweet spot) and keeps the "parallel" grid
    length even when the batch allows, so v7x's two TensorCores are both busy.
    """
    B8 = _round_up(max(B, 1), _SUBLANE)
    if batch_tile is not None:
        tile = _round_up(batch_tile, _SUBLANE)
        return tile, -(-B8 // tile)
    steps = -(-B8 // target)
    if steps == 1 and B8 >= 2 * _SUBLANE:
        steps = 2
    elif steps > 1 and steps % 2 == 1 and B8 >= (steps + 1) * _SUBLANE:
        steps += 1
    tile = _round_up(-(-B8 // steps), _SUBLANE)
    return tile, steps


def _estimate_vmem_bytes(batch_tile, input_dim, latent_dim, weights,
                         x_dtype, mask_dtype, out_dtype):
    """Rough VMEM footprint (lane-padded), used to set vmem_limit_bytes."""
    def blk(rows, cols, dt):
        return max(rows, 1) * _lane_pad(cols) * jnp.dtype(dt).itemsize

    est = 2 * blk(batch_tile, input_dim, x_dtype)            # x (double buffered)
    if mask_dtype is not None:
        est += 2 * blk(batch_tile, input_dim, mask_dtype)     # mask
    est += 2 * blk(batch_tile, input_dim, out_dtype)          # x_recon
    est += 2 * blk(batch_tile, latent_dim, out_dtype)         # z
    for a in weights:                                         # grid-invariant params
        est += 2 * blk(a.shape[0], a.shape[-1], a.dtype)
    widest = max([input_dim] + [int(a.shape[-1]) for a in weights])
    est += 4 * blk(batch_tile, widest, jnp.float32)           # live f32 intermediates
    return est


def _make_mae_kernel(has_mask):
    def kernel(*refs):
        idx = 0
        x = refs[idx][...]
        idx += 1
        if has_mask:
            x = x * refs[idx][...].astype(x.dtype)
            idx += 1
        (we0, be0, we1, be1, we2, be2,
         wd0, bd0, wd1, bd1, wd2, bd2) = refs[idx:idx + _NUM_WEIGHT_ARGS]
        xrec_ref, z_ref = refs[-2], refs[-1]

        def dense(a, w_ref, b_ref, relu):
            # MXU matmul with f32 accumulation; bias add + ReLU fused on the VPU.
            y = jnp.dot(a.astype(w_ref.dtype), w_ref[...],
                        preferred_element_type=jnp.float32) + b_ref[...]
            return jnp.maximum(y, 0.0) if relu else y

        # encoder: Linear -> ReLU -> Linear -> ReLU -> Linear
        h = dense(x, we0, be0, True)
        h = dense(h, we1, be1, True)
        z = dense(h, we2, be2, False)
        # decoder: Linear -> ReLU -> Linear -> ReLU -> Linear
        d = dense(z, wd0, bd0, True)
        d = dense(d, wd1, bd1, True)
        xr = dense(d, wd2, bd2, False)

        z_ref[...] = z.astype(z_ref.dtype)
        xrec_ref[...] = xr.astype(xrec_ref.dtype)

    return kernel


def masked_autoencoder_forward(x, mask, params, *, batch_tile=None,
                               compute_dtype=jnp.bfloat16):
    """Fused MAE forward: (x * mask) -> encoder -> z -> decoder -> x_recon.

    x:      [B, input_dim]
    mask:   [B, input_dim] or None (any dtype; converted on the VPU in-kernel)
    params: raw dict (weights (in,out), biases (1,out)) or output of prepare_params()
    returns (x_recon [B, input_dim], z [B, latent_dim]) in x.dtype
    """
    if not params.get("_prepared", False):
        params = prepare_params(params, compute_dtype)
    weights = [params[k] for k in _WEIGHT_KEYS]

    B, input_dim = x.shape
    latent_dim = params["we2"].shape[1]
    out_dtype = x.dtype
    has_mask = mask is not None

    batch_tile, steps = _pick_batch_tile(B, batch_tile)
    B_p = batch_tile * steps

    def pad_rows(a):
        return a if a.shape[0] == B_p else jnp.pad(a, ((0, B_p - a.shape[0]), (0, 0)))

    act_args = [pad_rows(x)]
    if has_mask:
        act_args.append(pad_rows(mask))

    def act_spec(cols):
        # last dim == full array dim (legal even when < 128); rows multiple of 8
        return pl.BlockSpec((batch_tile, cols), lambda i: (i, 0))

    def invariant_spec(shape):
        # grid-invariant weights/biases: whole array every step
        return pl.BlockSpec(shape, lambda i: (0,) * len(shape))

    in_specs = [act_spec(input_dim)]
    if has_mask:
        in_specs.append(act_spec(input_dim))
    in_specs += [invariant_spec(w.shape) for w in weights]

    out_specs = [act_spec(input_dim), act_spec(latent_dim)]
    out_shape = (jax.ShapeDtypeStruct((B_p, input_dim), out_dtype),
                 jax.ShapeDtypeStruct((B_p, latent_dim), out_dtype))

    # TODO(synk): for very large hidden_dims (e.g. 4k x 4k bf16 layers) the
    # all-weights-resident strategy would exceed v7x's 64 MiB VMEM; add an
    # N/K-tiled grid (reduction axis last, "arbitrary") for that regime.
    vmem_limit = int(min(64 * 2**20,
                         max(32 * 2**20,
                             2 * _estimate_vmem_bytes(
                                 batch_tile, input_dim, latent_dim, weights,
                                 x.dtype, mask.dtype if has_mask else None,
                                 out_dtype))))

    fwd = pl.pallas_call(
        _make_mae_kernel(has_mask),
        out_shape=out_shape,
        grid_spec=pltpu.PrefetchScalarGridSpec(
            num_scalar_prefetch=0,
            grid=(steps,),
            in_specs=in_specs,
            out_specs=out_specs,
        ),
        compiler_params=pltpu.CompilerParams(
            dimension_semantics=("parallel",),
            vmem_limit_bytes=vmem_limit),
    )
    xr_p, z_p = fwd(*act_args, *weights)

    if B_p != B:
        xr_p, z_p = xr_p[:B], z_p[:B]
    return xr_p, z_p


def init_params(key, input_dim, hidden_dims, latent_dim):
    """Deterministic synthetic init (shapes match the PyTorch module)."""
    params = {}
    enc_dims = [input_dim] + list(hidden_dims) + [latent_dim]
    dec_dims = [latent_dim] + list(hidden_dims[::-1]) + [input_dim]

    def linear(key, din, dout):
        kw, kb = jax.random.split(key)
        scale = 1.0 / jnp.sqrt(jnp.float32(din))
        w = jax.random.uniform(kw, (din, dout), jnp.float32, -scale, scale)
        b = jax.random.uniform(kb, (1, dout), jnp.float32, -scale, scale)
        return w, b

    keys = jax.random.split(key, len(enc_dims) - 1 + len(dec_dims) - 1)
    ki = 0
    for i in range(len(enc_dims) - 1):
        w, b = linear(keys[ki], enc_dims[i], enc_dims[i + 1]); ki += 1
        params[f"we{i}"] = w
        params[f"be{i}"] = b
    for i in range(len(dec_dims) - 1):
        w, b = linear(keys[ki], dec_dims[i], dec_dims[i + 1]); ki += 1
        params[f"wd{i}"] = w
        params[f"bd{i}"] = b
    return params


def reference_forward(x, mask, params):
    """Pure-JAX reference reproducing the PyTorch semantics (f32 throughout)."""
    xm = x * mask if mask is not None else x
    h = jnp.maximum(xm @ params["we0"] + params["be0"], 0.0)
    h = jnp.maximum(h @ params["we1"] + params["be1"], 0.0)
    z = h @ params["we2"] + params["be2"]
    d = jnp.maximum(z @ params["wd0"] + params["bd0"], 0.0)
    d = jnp.maximum(d @ params["wd1"] + params["bd1"], 0.0)
    xr = d @ params["wd2"] + params["bd2"]
    return xr, z


if __name__ == "__main__":
    # Shapes consistent with the module: input_dim=16, hidden_dims=[32,16], latent_dim=8.
    input_dim, hidden_dims, latent_dim = 16, [32, 16], 8

    key = jax.random.PRNGKey(0)
    kx, km, kp, kx2 = jax.random.split(key, 4)
    params = init_params(kp, input_dim, hidden_dims, latent_dim)

    # Prepare (cast) weights ONCE, hoisted out of the per-call path.
    params_bf16 = prepare_params(params, jnp.bfloat16)   # default compute path
    params_f32 = prepare_params(params, jnp.float32)     # exact-accuracy path

    # --- small batch, with mask, f32 compute (tight tolerance) ---
    B = 8
    x = jax.random.normal(kx, (B, input_dim), jnp.float32)
    mask = (jax.random.uniform(km, (B, input_dim)) > 0.25).astype(jnp.float32)
    xr_ref, z_ref = reference_forward(x, mask, params)

    xr, z = masked_autoencoder_forward(x, mask, params_f32)
    jax.block_until_ready((xr, z))
    assert xr.shape == (B, input_dim) and z.shape == (B, latent_dim)
    assert jnp.allclose(xr, xr_ref, atol=1e-4, rtol=1e-4)
    assert jnp.allclose(z, z_ref, atol=1e-4, rtol=1e-4)

    # --- default bf16 compute path (native MXU dtype on v5e/v6e/v7x) ---
    xr_bf, z_bf = masked_autoencoder_forward(x, mask, params_bf16)
    jax.block_until_ready((xr_bf, z_bf))
    assert jnp.allclose(xr_bf, xr_ref, atol=1e-1, rtol=1e-1)
    assert jnp.allclose(z_bf, z_ref, atol=1e-1, rtol=1e-1)

    # --- mask=None path (mask HBM stream dropped entirely) ---
    xr_nm, z_nm = masked_autoencoder_forward(x, None, params_f32)
    jax.block_until_ready((xr_nm, z_nm))
    xr_nm_ref, z_nm_ref = reference_forward(x, None, params)
    assert jnp.allclose(xr_nm, xr_nm_ref, atol=1e-4, rtol=1e-4)
    assert jnp.allclose(z_nm, z_nm_ref, atol=1e-4, rtol=1e-4)

    # --- larger batch: even multi-step "parallel" grid (2 steps x 304 rows) ---
    B2 = 600
    x2 = jax.random.normal(kx2, (B2, input_dim), jnp.float32)
    xr2, z2 = masked_autoencoder_forward(x2, None, params_f32)
    jax.block_until_ready((xr2, z2))
    xr2_ref, z2_ref = reference_forward(x2, None, params)
    assert xr2.shape == (B2, input_dim) and z2.shape == (B2, latent_dim)
    assert jnp.allclose(xr2, xr2_ref, atol=1e-4, rtol=1e-4)
    assert jnp.allclose(z2, z2_ref, atol=1e-4, rtol=1e-4)

    print("KERNEL_OK")
</pallas_src>

<mosaic_0001>
module attributes {stable_mosaic.version = 11 : i64} {
  func.func @kernel(%arg0: i32, %arg1: memref<8x16xf32, #tpu.memory_space<vmem>>, %arg2: memref<8x16xf32, #tpu.memory_space<vmem>>, %arg3: memref<16x32xf32, #tpu.memory_space<vmem>>, %arg4: memref<1x32xf32, #tpu.memory_space<vmem>>, %arg5: memref<32x16xf32, #tpu.memory_space<vmem>>, %arg6: memref<1x16xf32, #tpu.memory_space<vmem>>, %arg7: memref<16x8xf32, #tpu.memory_space<vmem>>, %arg8: memref<1x8xf32, #tpu.memory_space<vmem>>, %arg9: memref<8x16xf32, #tpu.memory_space<vmem>>, %arg10: memref<1x16xf32, #tpu.memory_space<vmem>>, %arg11: memref<16x32xf32, #tpu.memory_space<vmem>>, %arg12: memref<1x32xf32, #tpu.memory_space<vmem>>, %arg13: memref<32x16xf32, #tpu.memory_space<vmem>>, %arg14: memref<1x16xf32, #tpu.memory_space<vmem>>, %arg15: memref<8x16xf32, #tpu.memory_space<vmem>>, %arg16: memref<8x8xf32, #tpu.memory_space<vmem>>) attributes {dimension_semantics = [#tpu.dimension_semantics<parallel>], iteration_bounds = array<i64: 1>, scalar_prefetch = 0 : i64, scratch_operands = 0 : i64, tpu.core_type = #tpu.core_type<tc>, window_params = [{transform_indices = @transform_0, window_bounds = array<i64: 8, 16>}, {transform_indices = @transform_1, window_bounds = array<i64: 8, 16>}, {pipeline_mode = #tpu.pipeline_mode<synchronous>, transform_indices = @transform_2, window_bounds = array<i64: 16, 32>}, {pipeline_mode = #tpu.pipeline_mode<synchronous>, transform_indices = @transform_3, window_bounds = array<i64: 1, 32>}, {pipeline_mode = #tpu.pipeline_mode<synchronous>, transform_indices = @transform_4, window_bounds = array<i64: 32, 16>}, {pipeline_mode = #tpu.pipeline_mode<synchronous>, transform_indices = @transform_5, window_bounds = array<i64: 1, 16>}, {pipeline_mode = #tpu.pipeline_mode<synchronous>, transform_indices = @transform_6, window_bounds = array<i64: 16, 8>}, {pipeline_mode = #tpu.pipeline_mode<synchronous>, transform_indices = @transform_7, window_bounds = array<i64: 1, 8>}, {pipeline_mode = #tpu.pipeline_mode<synchronous>, transform_indices = @transform_8, window_bounds = array<i64: 8, 16>}, {pipeline_mode = #tpu.pipeline_mode<synchronous>, transform_indices = @transform_9, window_bounds = array<i64: 1, 16>}, {pipeline_mode = #tpu.pipeline_mode<synchronous>, transform_indices = @transform_10, window_bounds = array<i64: 16, 32>}, {pipeline_mode = #tpu.pipeline_mode<synchronous>, transform_indices = @transform_11, window_bounds = array<i64: 1, 32>}, {pipeline_mode = #tpu.pipeline_mode<synchronous>, transform_indices = @transform_12, window_bounds = array<i64: 32, 16>}, {pipeline_mode = #tpu.pipeline_mode<synchronous>, transform_indices = @transform_13, window_bounds = array<i64: 1, 16>}, {transform_indices = @transform_14, window_bounds = array<i64: 8, 16>}, {transform_indices = @transform_15, window_bounds = array<i64: 8, 8>}]} {
    %c0 = arith.constant 0 : index
    %c0_0 = arith.constant 0 : index
    %0 = vector.load %arg1[%c0, %c0_0] : memref<8x16xf32, #tpu.memory_space<vmem>>, vector<8x16xf32>
    %c0_1 = arith.constant 0 : index
    %c0_2 = arith.constant 0 : index
    %1 = vector.load %arg2[%c0_1, %c0_2] : memref<8x16xf32, #tpu.memory_space<vmem>>, vector<8x16xf32>
    %2 = arith.mulf %0, %1 : vector<8x16xf32>
    %c0_3 = arith.constant 0 : index
    %c0_4 = arith.constant 0 : index
    %3 = vector.load %arg3[%c0_3, %c0_4] : memref<16x32xf32, #tpu.memory_space<vmem>>, vector<16x32xf32>
    %cst = arith.constant dense<0.000000e+00> : vector<8x32xf32>
    %4 = tpu.matmul %2, %3, %cst {dimension_numbers = #tpu.dot_dimension_numbers<[1], [0], [0], [1], [0, 0, 1, 1], [], []>} : vector<8x16xf32>, vector<16x32xf32>, vector<8x32xf32> -> vector<8x32xf32>
    %c0_5 = arith.constant 0 : index
    %c0_6 = arith.constant 0 : index
    %5 = vector.load %arg4[%c0_5, %c0_6] : memref<1x32xf32, #tpu.memory_space<vmem>>, vector<1x32xf32>
    %6 = vector.broadcast %5 : vector<1x32xf32> to vector<8x32xf32>
    %7 = arith.addf %4, %6 : vector<8x32xf32>
    %cst_7 = arith.constant 0.000000e+00 : f32
    %8 = vector.broadcast %cst_7 : f32 to vector<8x32xf32>
    %9 = arith.maximumf %7, %8 : vector<8x32xf32>
    %c0_8 = arith.constant 0 : index
    %c0_9 = arith.constant 0 : index
    %10 = vector.load %arg5[%c0_8, %c0_9] : memref<32x16xf32, #tpu.memory_space<vmem>>, vector<32x16xf32>
    %cst_10 = arith.constant dense<0.000000e+00> : vector<8x16xf32>
    %11 = tpu.matmul %9, %10, %cst_10 {dimension_numbers = #tpu.dot_dimension_numbers<[1], [0], [0], [1], [0, 0, 1, 1], [], []>} : vector<8x32xf32>, vector<32x16xf32>, vector<8x16xf32> -> vector<8x16xf32>
    %c0_11 = arith.constant 0 : index
    %c0_12 = arith.constant 0 : index
    %12 = vector.load %arg6[%c0_11, %c0_12] : memref<1x16xf32, #tpu.memory_space<vmem>>, vector<1x16xf32>
    %13 = vector.broadcast %12 : vector<1x16xf32> to vector<8x16xf32>
    %14 = arith.addf %11, %13 : vector<8x16xf32>
    %cst_13 = arith.constant 0.000000e+00 : f32
    %15 = vector.broadcast %cst_13 : f32 to vector<8x16xf32>
    %16 = arith.maximumf %14, %15 : vector<8x16xf32>
    %c0_14 = arith.constant 0 : index
    %c0_15 = arith.constant 0 : index
    %17 = vector.load %arg7[%c0_14, %c0_15] : memref<16x8xf32, #tpu.memory_space<vmem>>, vector<16x8xf32>
    %cst_16 = arith.constant dense<0.000000e+00> : vector<8x8xf32>
    %18 = tpu.matmul %16, %17, %cst_16 {dimension_numbers = #tpu.dot_dimension_numbers<[1], [0], [0], [1], [0, 0, 1, 1], [], []>} : vector<8x16xf32>, vector<16x8xf32>, vector<8x8xf32> -> vector<8x8xf32>
    %c0_17 = arith.constant 0 : index
    %c0_18 = arith.constant 0 : index
    %19 = vector.load %arg8[%c0_17, %c0_18] : memref<1x8xf32, #tpu.memory_space<vmem>>, vector<1x8xf32>
    %20 = vector.broadcast %19 : vector<1x8xf32> to vector<8x8xf32>
    %21 = arith.addf %18, %20 : vector<8x8xf32>
    %c0_19 = arith.constant 0 : index
    %c0_20 = arith.constant 0 : index
    %22 = vector.load %arg9[%c0_19, %c0_20] : memref<8x16xf32, #tpu.memory_space<vmem>>, vector<8x16xf32>
    %cst_21 = arith.constant dense<0.000000e+00> : vector<8x16xf32>
    %23 = tpu.matmul %21, %22, %cst_21 {dimension_numbers = #tpu.dot_dimension_numbers<[1], [0], [0], [1], [0, 0, 1, 1], [], []>} : vector<8x8xf32>, vector<8x16xf32>, vector<8x16xf32> -> vector<8x16xf32>
    %c0_22 = arith.constant 0 : index
    %c0_23 = arith.constant 0 : index
    %24 = vector.load %arg10[%c0_22, %c0_23] : memref<1x16xf32, #tpu.memory_space<vmem>>, vector<1x16xf32>
    %25 = vector.broadcast %24 : vector<1x16xf32> to vector<8x16xf32>
    %26 = arith.addf %23, %25 : vector<8x16xf32>
    %cst_24 = arith.constant 0.000000e+00 : f32
    %27 = vector.broadcast %cst_24 : f32 to vector<8x16xf32>
    %28 = arith.maximumf %26, %27 : vector<8x16xf32>
    %c0_25 = arith.constant 0 : index
    %c0_26 = arith.constant 0 : index
    %29 = vector.load %arg11[%c0_25, %c0_26] : memref<16x32xf32, #tpu.memory_space<vmem>>, vector<16x32xf32>
    %cst_27 = arith.constant dense<0.000000e+00> : vector<8x32xf32>
    %30 = tpu.matmul %28, %29, %cst_27 {dimension_numbers = #tpu.dot_dimension_numbers<[1], [0], [0], [1], [0, 0, 1, 1], [], []>} : vector<8x16xf32>, vector<16x32xf32>, vector<8x32xf32> -> vector<8x32xf32>
    %c0_28 = arith.constant 0 : index
    %c0_29 = arith.constant 0 : index
    %31 = vector.load %arg12[%c0_28, %c0_29] : memref<1x32xf32, #tpu.memory_space<vmem>>, vector<1x32xf32>
    %32 = vector.broadcast %31 : vector<1x32xf32> to vector<8x32xf32>
    %33 = arith.addf %30, %32 : vector<8x32xf32>
    %cst_30 = arith.constant 0.000000e+00 : f32
    %34 = vector.broadcast %cst_30 : f32 to vector<8x32xf32>
    %35 = arith.maximumf %33, %34 : vector<8x32xf32>
    %c0_31 = arith.constant 0 : index
    %c0_32 = arith.constant 0 : index
    %36 = vector.load %arg13[%c0_31, %c0_32] : memref<32x16xf32, #tpu.memory_space<vmem>>, vector<32x16xf32>
    %cst_33 = arith.constant dense<0.000000e+00> : vector<8x16xf32>
    %37 = tpu.matmul %35, %36, %cst_33 {dimension_numbers = #tpu.dot_dimension_numbers<[1], [0], [0], [1], [0, 0, 1, 1], [], []>} : vector<8x32xf32>, vector<32x16xf32>, vector<8x16xf32> -> vector<8x16xf32>
    %c0_34 = arith.constant 0 : index
    %c0_35 = arith.constant 0 : index
    %38 = vector.load %arg14[%c0_34, %c0_35] : memref<1x16xf32, #tpu.memory_space<vmem>>, vector<1x16xf32>
    %39 = vector.broadcast %38 : vector<1x16xf32> to vector<8x16xf32>
    %40 = arith.addf %37, %39 : vector<8x16xf32>
    %c0_36 = arith.constant 0 : index
    %c0_37 = arith.constant 0 : index
    %41 = vector.load %arg16[%c0_36, %c0_37] : memref<8x8xf32, #tpu.memory_space<vmem>>, vector<8x8xf32>
    tpu.vector_store %arg16[%c0_36, %c0_37], %21 {strides = array<i32>} : memref<8x8xf32, #tpu.memory_space<vmem>>, vector<8x8xf32>,
    %c0_38 = arith.constant 0 : index
    %c0_39 = arith.constant 0 : index
    %42 = vector.load %arg15[%c0_38, %c0_39] : memref<8x16xf32, #tpu.memory_space<vmem>>, vector<8x16xf32>
    tpu.vector_store %arg15[%c0_38, %c0_39], %40 {strides = array<i32>} : memref<8x16xf32, #tpu.memory_space<vmem>>, vector<8x16xf32>,
    return
  }
  func.func @transform_0(%arg0: i32) -> (i32, i32) {
    %c0_i32 = arith.constant 0 : i32
    %c0_i32_0 = arith.constant 0 : i32
    return %arg0, %c0_i32 : i32, i32
  }
  func.func @transform_1(%arg0: i32) -> (i32, i32) {
    %c0_i32 = arith.constant 0 : i32
    %c0_i32_0 = arith.constant 0 : i32
    return %arg0, %c0_i32 : i32, i32
  }
  func.func @transform_2(%arg0: i32) -> (i32, i32) {
    %c0_i32 = arith.constant 0 : i32
    %c0_i32_0 = arith.constant 0 : i32
    %c0_i32_1 = arith.constant 0 : i32
    return %c0_i32, %c0_i32_0 : i32, i32
  }
  func.func @transform_3(%arg0: i32) -> (i32, i32) {
    %c0_i32 = arith.constant 0 : i32
    %c0_i32_0 = arith.constant 0 : i32
    %c0_i32_1 = arith.constant 0 : i32
    return %c0_i32, %c0_i32_0 : i32, i32
  }
  func.func @transform_4(%arg0: i32) -> (i32, i32) {
    %c0_i32 = arith.constant 0 : i32
    %c0_i32_0 = arith.constant 0 : i32
    %c0_i32_1 = arith.constant 0 : i32
    return %c0_i32, %c0_i32_0 : i32, i32
  }
  func.func @transform_5(%arg0: i32) -> (i32, i32) {
    %c0_i32 = arith.constant 0 : i32
    %c0_i32_0 = arith.constant 0 : i32
    %c0_i32_1 = arith.constant 0 : i32
    return %c0_i32, %c0_i32_0 : i32, i32
  }
  func.func @transform_6(%arg0: i32) -> (i32, i32) {
    %c0_i32 = arith.constant 0 : i32
    %c0_i32_0 = arith.constant 0 : i32
    %c0_i32_1 = arith.constant 0 : i32
    return %c0_i32, %c0_i32_0 : i32, i32
  }
  func.func @transform_7(%arg0: i32) -> (i32, i32) {
    %c0_i32 = arith.constant 0 : i32
    %c0_i32_0 = arith.constant 0 : i32
    %c0_i32_1 = arith.constant 0 : i32
    return %c0_i32, %c0_i32_0 : i32, i32
  }
  func.func @transform_8(%arg0: i32) -> (i32, i32) {
    %c0_i32 = arith.constant 0 : i32
    %c0_i32_0 = arith.constant 0 : i32
    %c0_i32_1 = arith.constant 0 : i32
    return %c0_i32, %c0_i32_0 : i32, i32
  }
  func.func @transform_9(%arg0: i32) -> (i32, i32) {
    %c0_i32 = arith.constant 0 : i32
    %c0_i32_0 = arith.constant 0 : i32
    %c0_i32_1 = arith.constant 0 : i32
    return %c0_i32, %c0_i32_0 : i32, i32
  }
  func.func @transform_10(%arg0: i32) -> (i32, i32) {
    %c0_i32 = arith.constant 0 : i32
    %c0_i32_0 = arith.constant 0 : i32
    %c0_i32_1 = arith.constant 0 : i32
    return %c0_i32, %c0_i32_0 : i32, i32
  }
  func.func @transform_11(%arg0: i32) -> (i32, i32) {
    %c0_i32 = arith.constant 0 : i32
    %c0_i32_0 = arith.constant 0 : i32
    %c0_i32_1 = arith.constant 0 : i32
    return %c0_i32, %c0_i32_0 : i32, i32
  }
  func.func @transform_12(%arg0: i32) -> (i32, i32) {
    %c0_i32 = arith.constant 0 : i32
    %c0_i32_0 = arith.constant 0 : i32
    %c0_i32_1 = arith.constant 0 : i32
    return %c0_i32, %c0_i32_0 : i32, i32
  }
  func.func @transform_13(%arg0: i32) -> (i32, i32) {
    %c0_i32 = arith.constant 0 : i32
    %c0_i32_0 = arith.constant 0 : i32
    %c0_i32_1 = arith.constant 0 : i32
    return %c0_i32, %c0_i32_0 : i32, i32
  }
  func.func @transform_14(%arg0: i32) -> (i32, i32) {
    %c0_i32 = arith.constant 0 : i32
    %c0_i32_0 = arith.constant 0 : i32
    return %arg0, %c0_i32 : i32, i32
  }
  func.func @transform_15(%arg0: i32) -> (i32, i32) {
    %c0_i32 = arith.constant 0 : i32
    %c0_i32_0 = arith.constant 0 : i32
    return %arg0, %c0_i32 : i32, i32
  }
}

</mosaic_0001>

<bundles_post_ra>
// kernel: tpu_custom_call.1
= control target key start
LH: loop header
LB: loop body
LE: loop exit
PB: predicated region body
PF: predicated region fallthrough
CT: control target
= control target key end

     0   :  { %21 = vsyncpa [#allocation3], 0  ;;  %v741_v3 = vmov 0.0|0.0   ;;  %vm742_vm0 = vmmov 0   ;;  %v743_v5 = vmov 0.0   ;;  %s938_s0 = inlined_call_operand.vmem [shape: f32[8,16], index: 0, kind: input, shape index: {}]   ;;  %s939_s1 = inlined_call_operand.vmem [shape: f32[8,16], index: 1, kind: input, shape index: {}]   ;;  %s940_s2 = inlined_call_operand.vmem [shape: f32[16,32], index: 2, kind: input, shape index: {}]   ;;  %s941_s3 = inlined_call_operand.vmem [shape: f32[1,32], index: 3, kind: input, shape index: {}]   ;;  %s942_s4 = inlined_call_operand.vmem [shape: f32[32,16], index: 4, kind: input, shape index: {}]   ;;  %s943_s5 = inlined_call_operand.vmem [shape: f32[1,16], index: 5, kind: input, shape index: {}]   ;;  %s944_s6 = inlined_call_operand.vmem [shape: f32[16,8], index: 6, kind: input, shape index: {}]   ;;  %s945_s7 = inlined_call_operand.vmem [shape: f32[1,8], index: 7, kind: input, shape index: {}]   ;;  %s946_s8 = inlined_call_operand.vmem [shape: f32[8,16], index: 8, kind: input, shape index: {}]   ;;  %s947_s9 = inlined_call_operand.vmem [shape: f32[1,16], index: 9, kind: input, shape index: {}]   ;;  %s948_s10 = inlined_call_operand.vmem [shape: f32[16,32], index: 10, kind: input, shape index: {}]   ;;  %s949_s11 = inlined_call_operand.vmem [shape: f32[1,32], index: 11, kind: input, shape index: {}]   ;;  %s950_s12 = inlined_call_operand.vmem [shape: f32[32,16], index: 12, kind: input, shape index: {}]   ;;  %s951_s13 = inlined_call_operand.vmem [shape: f32[1,16], index: 13, kind: input, shape index: {}]   ;;  %s952_s14 = inlined_call_operand.hbm [shape: f32[8,16], index: 14, kind: output, shape index: {0}]   ;;  %s953_s15 = inlined_call_operand.hbm [shape: f32[8,8], index: 15, kind: output, shape index: {1}]  }
   0x1   :  { %v54_v0 = vld [vmem:[%s940_s2] sm:$0xff]  ;;  %v55_v1 = vld [vmem:[%s940_s2 + $0x8] sm:$0xff]  ;;  %667 = vmatprep.subr.bf16.mxu1 %v741_v3  ;;  %623 = vmatprep.mubr.msk.f32.mxu1 %vm742_vm0, %v743_v5 }
   0x2   :  { %v51_v2 = vld [vmem:[%s938_s0] sm:$0xff]  ;;  %v668_v4 = vpack.c.bf16 %v55_v1, %v54_v0  ;;  %v139_v8 = vld [vmem:[%s942_s4 + $0x8] sm:$0xff]  ;;  %676 = vmatprep.subr.bf16.mxu0 %v741_v3  ;;  %641 = vmatprep.mubr.msk.f32.mxu0 %vm742_vm0, %v743_v5 }
   0x3   :  { %v52_v6 = vld [vmem:[%s939_s1] sm:$0xff] }
   0x4   :  { %v138_v7 = vld [vmem:[%s942_s4] sm:$0xff]  ;;  %v53_v9 = vmul.f32 %v52_v6, %v51_v2 }
   0x5   :  { %22 = vsyncpa [#allocation5], 0  ;;  %669 = vmatpush3.bf16.msra.mxu1 %v668_v4  ;;  %vm63_vm1 = vcmask 130048   ;;  %v671_v10 = vpack.c.bf16 %v139_v8, %v138_v7  ;;  %v140_v11 = vld [vmem:[%s942_s4 + $0x10] sm:$0xff]  ;;  %v141_v12 = vld [vmem:[%s942_s4 + $0x18] sm:$0xff]  ;;  %vm149_vm2 = vcmask 261120  }
   0x6   :  { %670 = vmatprep.subr.bf16.mxu1 %v741_v3  ;;  %v674_v13 = vpack.c.bf16 %v141_v12, %v140_v11  ;;  %v586_v14 = vld [vmem:[%s941_s3] ss:$0 sm:$0xff]  ;;  %v225_v20 = vld [vmem:[%s944_s6 + $0x8] sm:$0xff]  ;;  %vm314_vm3 = vcmask 64512   ;;  %v474_v43 = vld [vmem:[%s950_s12 + $0x10] sm:$0xff] }
   0x7   :  { %v224_v19 = vld [vmem:[%s944_s6] sm:$0xff]  ;;  %v390_v33 = vld [vmem:[%s948_s10 + $0x8] sm:$0xff]  ;;  %v475_v44 = vld [vmem:[%s950_s12 + $0x18] sm:$0xff] }
   0x8   :  { %624 = vmatmul.mubr.msk.f32.vlgmr.msra.gmra.mrb[0].mxu1 %vm63_vm1, %v53_v9  ;;  %v677_v21 = vpack.c.bf16 %v225_v20, %v224_v19  ;;  %v588_v22 = vld [vmem:[%s943_s5] ss:$0 sm:$0xff]  ;;  %v473_v36 = vld [vmem:[%s950_s12 + $0x8] sm:$0xff]  ;;  %v686_v45 = vpack.c.bf16 %v475_v44, %v474_v43 }
   0x9   :  { %672 = vmatpush3.bf16.msra.mxu1 %v671_v10  ;;  %634 = vmatprep.mubr.msk.f32.mxu1 %vm742_vm0, %v743_v5  ;;  %v306_v27 = vld [vmem:[%s946_s8] sm:$0xff] }
   0xa   :  { %673 = vmatprep.subr.bf16.mxu1 %v741_v3  ;;  %678 = vmatpush3.bf16.msra.mxu0 %v677_v21  ;;  %v590_v28 = vld [vmem:[%s945_s7] ss:$0 sm:$0xff] }
   0xb   :  { %644 = vmatprep.subr.mxu0 %v743_v5  ;;  %v389_v32 = vld [vmem:[%s948_s10] sm:$0xff] }
   0xc   :  { %v680_v34 = vpack.c.bf16 %v390_v33, %v389_v32  ;;  %v472_v35 = vld [vmem:[%s950_s12] sm:$0xff] }
   0xd   :  { %675 = vmatpush3.bf16.msra.mxu1 %v674_v13  ;;  %v683_v37 = vpack.c.bf16 %v473_v36, %v472_v35  ;;  %v592_v38 = vld [vmem:[%s947_s9] ss:$0 sm:$0xff]  ;;  %s744_s9 = smov [#allocation4]  }
   0xe   :  { %679 = vmatprep.subr.bf16.mxu1 %v741_v3  ;;  %v594_v46 = vld [vmem:[%s949_s11] ss:$0 sm:$0xff]  ;;  %s574_s19 = sshll.u32 %s744_s9, 4  ;;  %s575_s19 = int_to_ptr.vmem [resolvable:$true] %s574_s19 }
   0xf   :  { %s693_s4 = scalar_lea.vmem %s575_s19, 128  ;;  %p698_p1 = scmp.lt.s32.totalorder %s575_s19, %s575_s19 }
  0x10   :  { %p694_p0 = scmp.ne.s32.totalorder %s575_s19, %s693_s4  ;;  %p699_p2 = scmp.lt.s32.totalorder %s693_s4, %s693_s4 }
  0x12   :  { %p700_p3 = por %p699_p2, %p698_p1 }
  0x14   :  { %p701_p4 = pnand %p700_p3, %p694_p0 }
  0xdb   :  { %v133_v15 = vpop.f32.mrb[0].mxu1 }
  0xdc   :  { %v134_v16 = vadd.f32 %v586_v14, %v133_v15  ;;  %v625_v17 = vpop.f32.mrb[1].mxu1 }
  0xde   :  { %v137_v18 = vmax.f32 %v134_v16, 0.0 }
  0xe0   :  { %635 = vmatmul.mubr.msk.f32.vlgmr.msra.gmra.mrb[2].mxu1 %vm149_vm2, %v137_v18 }
  0xe1   :  { %653 = vmatprep.mubr.msk.f32.mxu1 %vm742_vm0, %v743_v5  ;;  %681 = vmatpush3.bf16.msra.mxu1 %v680_v34 }
 0x1b3   :  { %v219_v23 = vpop.f32.mrb[2].mxu1 }
 0x1b4   :  { %v220_v24 = vadd.f32 %v588_v22, %v219_v23  ;;  %v636_v25 = vpop.f32.mrb[3].mxu1 }
 0x1b6   :  { %v223_v26 = vmax.f32 %v220_v24, 0.0 }
 0x1b8   :  { %642 = vmatmul.mubr.msk.f32.vlgmr.msra.gmra.mrb[0].mxu0 %vm63_vm1, %v223_v26 }
 0x1b9   :  { %645 = vmatpush3.msra.mxu0 %v306_v27  ;;  %646 = vmatprep.mubr.msk.f32.mxu0 %vm742_vm0, %v743_v5 }
 0x1ba   :  { %682 = vmatprep.subr.bf16.mxu0 %v741_v3 }
 0x28b   :  { %v302_v29 = vpop.f32.mrb[0].mxu0 }
 0x28c   :  { %v303_v30 = vadd.f32 %v590_v28, %v302_v29  ;;  %v643_v31 = vpop.f32.mrb[1].mxu0 }
 0x28e   :  { %647 = vmatmul.mubr.msk.f32.vlgmr.msra.gmra.mrb[2].mxu0 %vm314_vm3, %v303_v30  ;;  %556 = vst.msk [vmem:[#allocation4] sm:$0xff] %vm314_vm3, %v303_v30 }
 0x28f   :  { %664 = vmatprep.mubr.msk.f32.mxu0 %vm742_vm0, %v743_v5  ;;  %684 = vmatpush3.bf16.msra.mxu0 %v683_v37 }
 0x290   :  { %685 = vmatprep.subr.bf16.mxu0 %v741_v3 }
 0x293   :  { %687 = vmatpush3.bf16.msra.mxu0 %v686_v45 }
 0x361   :  { %v384_v39 = vpop.f32.mrb[2].mxu0 }
 0x362   :  { %v385_v40 = vadd.f32 %v592_v38, %v384_v39  ;;  %v648_v41 = vpop.f32.mrb[3].mxu0 }
 0x364   :  { %v388_v42 = vmax.f32 %v385_v40, 0.0 }
 0x366   :  { %654 = vmatmul.mubr.msk.f32.vlgmr.msra.gmra.mrb[4].mxu1 %vm63_vm1, %v388_v42 }
 0x439   :  { %v467_v47 = vpop.f32.mrb[4].mxu1 }
 0x43a   :  { %v468_v48 = vadd.f32 %v594_v46, %v467_v47  ;;  %v655_v49 = vpop.f32.mrb[5].mxu1 }
 0x43c   :  { %v471_v50 = vmax.f32 %v468_v48, 0.0 }
 0x43e   :  { %665 = vmatmul.mubr.msk.f32.vlgmr.msra.gmra.mrb[4].mxu0 %vm149_vm2, %v471_v50 }
 0x43f   :  { %704 = shalt.err (!%p701_p4)
}
 0x440   :  { %s705_s11 = scalar_lea.hbm %s953_s15, 128 }
 0x441   :  { %p706_p5 = scmp.ne.s32.totalorder %s953_s15, %s705_s11  ;;  %p709_p6 = scmp.lt.u32.totalorder %s705_s11, %s953_s15 }
 0x443   :  { %p711_p7 = pnand %p709_p6, %p706_p5 }
 0x445   :  { %714 = shalt.err (!%p711_p7)
}
 0x446   :  { %577 = dma.vmem_to_hbm [thread:$0]  %s575_s19, 128, %s953_s15, [#allocation5]   ;;  %v596_v51 = vld [vmem:[%s951_s13] ss:$0 sm:$0xff] }
 0x447   :  { %s745_s25 = smov [#allocation2]  }
 0x448   :  { %s564_s26 = sshll.u32 %s745_s25, 4  ;;  %s565_s26 = int_to_ptr.vmem [resolvable:$true] %s564_s26 }
 0x449   :  { %s715_s27 = scalar_lea.vmem %s565_s26, 128  ;;  %p720_p9 = scmp.lt.s32.totalorder %s565_s26, %s565_s26 }
 0x44a   :  { %p716_p8 = scmp.ne.s32.totalorder %s565_s26, %s715_s27  ;;  %p721_p10 = scmp.lt.s32.totalorder %s715_s27, %s715_s27 }
 0x44c   :  { %p722_p11 = por %p721_p10, %p720_p9 }
 0x44e   :  { %p723_p12 = pnand %p722_p11, %p716_p8 }
 0x511   :  { %v552_v52 = vpop.f32.mrb[4].mxu0 }
 0x512   :  { %v553_v53 = vadd.f32 %v596_v51, %v552_v52  ;;  %v666_v54 = vpop.f32.mrb[5].mxu0 }
 0x514   :  { %557 = vst.msk [vmem:[#allocation2] sm:$0xff] %vm63_vm1, %v553_v53 }
 0x515   :  { %726 = shalt.err (!%p723_p12)
}
 0x516   :  { %s727_s2 = scalar_lea.hbm %s952_s14, 128 }
 0x517   :  { %p728_p13 = scmp.ne.s32.totalorder %s952_s14, %s727_s2  ;;  %p731_p0 = scmp.lt.u32.totalorder %s727_s2, %s952_s14 }
 0x519   :  { %p733_p1 = pnand %p731_p0, %p728_p13 }
 0x51b   :  { %736 = shalt.err (!%p733_p1)
}
 0x51c   :  { %567 = dma.vmem_to_hbm [thread:$0]  %s565_s26, 128, %s952_s14, [#allocation3]  }
 0x51d   :  { %737 = dma.done.wait [#allocation3], 128  }
 0x51e   :  { %738 = vsyncadd [#allocation3], 4294967168 }
 0x51f   :  { %739 = dma.done.wait [#allocation5], 128  }
 0x520   :  { %740 = vsyncadd [#allocation5], 4294967168 }
 0x521   :  { %584 = vsyncpa [#allocation3], 1 }
 0x522   :  { %585 = vsyncpa [#allocation5], 1 }

</bundles_post_ra>
